<compile_context>
chip_gen: v6e
topology: v6e:2x2x1
jax: 0.10.0
libtpu: 0.0.40
codegen_flags: <defaults>
</compile_context>

<pallas_src>
import jax
import jax.numpy as jnp
from jax.experimental import pallas as pl
from jax.experimental.pallas import tpu as pltpu


def _round_up(n: int, m: int) -> int:
    return (n + m - 1) // m * m


def _pick_batch_tile(b8: int) -> int:
    """Rows of x per grid step (b8 = batch rounded up to 8)."""
    if b8 <= 16:
        return b8
    # >= 2 grid steps (both v7x TCs get work); largest tile whose padding
    # stays <= 25% of the batch; otherwise minimize padding.
    cands = [t for t in (512, 256, 128, 64, 32, 16, 8) if 2 * t <= b8]
    for t in cands:                       # largest first
        if _round_up(b8, t) - b8 <= b8 // 4:
            return t
    return min(cands, key=lambda t: _round_up(b8, t) - b8)


def _pad2(a, rows: int, cols: int):
    pr, pc = rows - a.shape[0], cols - a.shape[1]
    if pr == 0 and pc == 0:
        return a                          # already aligned: no wrapper op
    return jnp.pad(a, ((0, pr), (0, pc)))


def _mlp_kernel(x_ref, w1_ref, b1_ref, w2_ref, b2_ref, o_ref):
    # x: [TB, D] f32, w1: [D, H] f32, b1: [1, H] f32,
    # w2: [H, O_pad] f32, b2: [1, O_pad] f32, o: [TB, O_pad] f32.
    # Pure-f32 MXU matmuls (matches the f32 PyTorch tmodel; compute is not the
    # bottleneck at these shapes).
    h = jnp.dot(x_ref[...], w1_ref[...], preferred_element_type=jnp.float32)
    h = jnp.maximum(h + b1_ref[...], 0.0)
    y = jnp.dot(h, w2_ref[...], preferred_element_type=jnp.float32)
    o_ref[...] = (y + b2_ref[...]).astype(o_ref.dtype)


def _build_call(TB, D_pad, H_pad, O_pad, B_pad, single_buffer_weights):
    def const_spec(shape):
        # Block index never changes across the grid -> one VMEM buffer is
        # enough (default double-buffering would just double weight VMEM).
        if single_buffer_weights:
            return pl.BlockSpec(shape, lambda i: (0, 0),
                                pipeline_mode=pl.Buffered(1))
        return pl.BlockSpec(shape, lambda i: (0, 0))

    cost = pl.CostEstimate(
        flops=2 * B_pad * D_pad * H_pad + 2 * B_pad * H_pad * O_pad,
        transcendentals=0,
        bytes_accessed=4 * (B_pad * D_pad + D_pad * H_pad + H_pad
                            + H_pad * O_pad + O_pad + B_pad * O_pad),
    )

    return pl.pallas_call(
        _mlp_kernel,
        out_shape=jax.ShapeDtypeStruct((B_pad, O_pad), jnp.float32),
        grid=(B_pad // TB,),
        in_specs=[
            pl.BlockSpec((TB, D_pad), lambda i: (i, 0)),   # x (batch-tiled)
            const_spec((D_pad, H_pad)),                    # w1 (resident)
            const_spec((1, H_pad)),                        # b1
            const_spec((H_pad, O_pad)),                    # w2 (resident)
            const_spec((1, O_pad)),                        # b2
        ],
        out_specs=pl.BlockSpec((TB, O_pad), lambda i: (i, 0)),
        compiler_params=pltpu.CompilerParams(
            dimension_semantics=("parallel",),             # megacore on v7x
        ),
        cost_estimate=cost,
    )


def shared_model_forward(x_nchw, w1, b1, w2, b2):
    """Forward pass of shared_model (wrapping a flatten + 2-layer MLP tmodel)."""
    B = x_nchw.shape[0]
    D = 1
    for d in x_nchw.shape[1:]:
        D *= d
    H = w1.shape[1]
    O = w2.shape[1]

    x = x_nchw.reshape(B, D).astype(jnp.float32)

    D_pad = _round_up(D, 128)
    H_pad = _round_up(H, 128)
    O_pad = _round_up(O, 128)                  # lane-dense (unmasked) store
    TB = _pick_batch_tile(_round_up(B, 8))
    B_pad = _round_up(B, TB)

    # Only pad what actually needs it; no dtype round trips.
    x_p = _pad2(x, B_pad, D_pad)
    w1_p = _pad2(w1.astype(jnp.float32), D_pad, H_pad)
    b1_p = _pad2(b1.reshape(1, H).astype(jnp.float32), 1, H_pad)
    w2_p = _pad2(w2.astype(jnp.float32), H_pad, O_pad)
    b2_p = _pad2(b2.reshape(1, O).astype(jnp.float32), 1, O_pad)
    args = (x_p, w1_p, b1_p, w2_p, b2_p)

    try:
        out = _build_call(TB, D_pad, H_pad, O_pad, B_pad, True)(*args)
    except Exception:
        # Fallback if this jax build rejects pipeline_mode=pl.Buffered(1);
        # identical numerics, just default double-buffered weight blocks.
        out = _build_call(TB, D_pad, H_pad, O_pad, B_pad, False)(*args)

    # Padded batch rows / output lanes hold garbage -> slice them off.
    return out[:B, :O]


if __name__ == "__main__":
    key = jax.random.PRNGKey(0)
    kx, k1, k2, k3, k4 = jax.random.split(key, 5)

    # Small shapes consistent with an image-classifier tmodel.
    B, C, Hh, Ww = 2, 4, 16, 16
    D = C * Hh * Ww          # 1024
    HID = 128
    OUT = 16

    x = jax.random.normal(kx, (B, C, Hh, Ww), dtype=jnp.float32)
    w1 = jax.random.normal(k1, (D, HID), dtype=jnp.float32) * (1.0 / jnp.sqrt(D))
    b1 = jax.random.normal(k2, (HID,), dtype=jnp.float32) * 0.01
    w2 = jax.random.normal(k3, (HID, OUT), dtype=jnp.float32) * (1.0 / jnp.sqrt(HID))
    b2 = jax.random.normal(k4, (OUT,), dtype=jnp.float32) * 0.01

    y = shared_model_forward(x, w1, b1, w2, b2)
    y = jax.block_until_ready(y)

    # Pure-f32 JAX reference (same semantics as the f32 PyTorch tmodel).
    x_flat = x.reshape(B, D)
    h_ref = jnp.maximum(x_flat @ w1 + b1, 0.0)
    ref = h_ref @ w2 + b2

    assert y.shape == (B, OUT)
    assert jnp.allclose(y, ref, atol=2e-2, rtol=2e-2)

    print("KERNEL_OK")
</pallas_src>

<mosaic_0001>
module attributes {stable_mosaic.version = 11 : i64} {
  func.func @_mlp_kernel(%arg0: i32, %arg1: memref<8x1024xf32, #tpu.memory_space<vmem>>, %arg2: memref<1024x128xf32, #tpu.memory_space<vmem>>, %arg3: memref<1x128xf32, #tpu.memory_space<vmem>>, %arg4: memref<128x128xf32, #tpu.memory_space<vmem>>, %arg5: memref<1x128xf32, #tpu.memory_space<vmem>>, %arg6: memref<8x128xf32, #tpu.memory_space<vmem>>) attributes {dimension_semantics = [#tpu.dimension_semantics<parallel>], iteration_bounds = array<i64: 1>, scalar_prefetch = 0 : i64, scratch_operands = 0 : i64, tpu.core_type = #tpu.core_type<tc>, window_params = [{transform_indices = @transform_0, window_bounds = array<i64: 8, 1024>}, {pipeline_mode = #tpu.pipeline_mode<synchronous>, transform_indices = @transform_1, window_bounds = array<i64: 1024, 128>}, {pipeline_mode = #tpu.pipeline_mode<synchronous>, transform_indices = @transform_2, window_bounds = array<i64: 1, 128>}, {pipeline_mode = #tpu.pipeline_mode<synchronous>, transform_indices = @transform_3, window_bounds = array<i64: 128, 128>}, {pipeline_mode = #tpu.pipeline_mode<synchronous>, transform_indices = @transform_4, window_bounds = array<i64: 1, 128>}, {transform_indices = @transform_5, window_bounds = array<i64: 8, 128>}]} {
    %c0 = arith.constant 0 : index
    %c0_0 = arith.constant 0 : index
    %0 = vector.load %arg1[%c0, %c0_0] : memref<8x1024xf32, #tpu.memory_space<vmem>>, vector<8x1024xf32>
    %c0_1 = arith.constant 0 : index
    %c0_2 = arith.constant 0 : index
    %1 = vector.load %arg2[%c0_1, %c0_2] : memref<1024x128xf32, #tpu.memory_space<vmem>>, vector<1024x128xf32>
    %cst = arith.constant dense<0.000000e+00> : vector<8x128xf32>
    %2 = tpu.matmul %0, %1, %cst {dimension_numbers = #tpu.dot_dimension_numbers<[1], [0], [0], [1], [0, 0, 1, 1], [], []>} : vector<8x1024xf32>, vector<1024x128xf32>, vector<8x128xf32> -> vector<8x128xf32>
    %c0_3 = arith.constant 0 : index
    %c0_4 = arith.constant 0 : index
    %3 = vector.load %arg3[%c0_3, %c0_4] : memref<1x128xf32, #tpu.memory_space<vmem>>, vector<1x128xf32>
    %4 = vector.broadcast %3 : vector<1x128xf32> to vector<8x128xf32>
    %5 = arith.addf %2, %4 : vector<8x128xf32>
    %cst_5 = arith.constant 0.000000e+00 : f32
    %6 = vector.broadcast %cst_5 : f32 to vector<8x128xf32>
    %7 = arith.maximumf %5, %6 : vector<8x128xf32>
    %c0_6 = arith.constant 0 : index
    %c0_7 = arith.constant 0 : index
    %8 = vector.load %arg4[%c0_6, %c0_7] : memref<128x128xf32, #tpu.memory_space<vmem>>, vector<128x128xf32>
    %cst_8 = arith.constant dense<0.000000e+00> : vector<8x128xf32>
    %9 = tpu.matmul %7, %8, %cst_8 {dimension_numbers = #tpu.dot_dimension_numbers<[1], [0], [0], [1], [0, 0, 1, 1], [], []>} : vector<8x128xf32>, vector<128x128xf32>, vector<8x128xf32> -> vector<8x128xf32>
    %c0_9 = arith.constant 0 : index
    %c0_10 = arith.constant 0 : index
    %10 = vector.load %arg5[%c0_9, %c0_10] : memref<1x128xf32, #tpu.memory_space<vmem>>, vector<1x128xf32>
    %11 = vector.broadcast %10 : vector<1x128xf32> to vector<8x128xf32>
    %12 = arith.addf %9, %11 : vector<8x128xf32>
    %c0_11 = arith.constant 0 : index
    %c0_12 = arith.constant 0 : index
    %13 = vector.load %arg6[%c0_11, %c0_12] : memref<8x128xf32, #tpu.memory_space<vmem>>, vector<8x128xf32>
    tpu.vector_store %arg6[%c0_11, %c0_12], %12 {strides = array<i32>} : memref<8x128xf32, #tpu.memory_space<vmem>>, vector<8x128xf32>,
    return
  }
  func.func @transform_0(%arg0: i32) -> (i32, i32) {
    %c0_i32 = arith.constant 0 : i32
    %c0_i32_0 = arith.constant 0 : i32
    return %arg0, %c0_i32 : i32, i32
  }
  func.func @transform_1(%arg0: i32) -> (i32, i32) {
    %c0_i32 = arith.constant 0 : i32
    %c0_i32_0 = arith.constant 0 : i32
    %c0_i32_1 = arith.constant 0 : i32
    return %c0_i32, %c0_i32_0 : i32, i32
  }
  func.func @transform_2(%arg0: i32) -> (i32, i32) {
    %c0_i32 = arith.constant 0 : i32
    %c0_i32_0 = arith.constant 0 : i32
    %c0_i32_1 = arith.constant 0 : i32
    return %c0_i32, %c0_i32_0 : i32, i32
  }
  func.func @transform_3(%arg0: i32) -> (i32, i32) {
    %c0_i32 = arith.constant 0 : i32
    %c0_i32_0 = arith.constant 0 : i32
    %c0_i32_1 = arith.constant 0 : i32
    return %c0_i32, %c0_i32_0 : i32, i32
  }
  func.func @transform_4(%arg0: i32) -> (i32, i32) {
    %c0_i32 = arith.constant 0 : i32
    %c0_i32_0 = arith.constant 0 : i32
    %c0_i32_1 = arith.constant 0 : i32
    return %c0_i32, %c0_i32_0 : i32, i32
  }
  func.func @transform_5(%arg0: i32) -> (i32, i32) {
    %c0_i32 = arith.constant 0 : i32
    %c0_i32_0 = arith.constant 0 : i32
    return %arg0, %c0_i32 : i32, i32
  }
}

module attributes {stable_mosaic.version = 11 : i64} {
  func.func @_mlp_kernel(%arg0: i32, %arg1: memref<8x1024xf32, #tpu.memory_space<vmem>>, %arg2: memref<1024x128xf32, #tpu.memory_space<vmem>>, %arg3: memref<1x128xf32, #tpu.memory_space<vmem>>, %arg4: memref<128x128xf32, #tpu.memory_space<vmem>>, %arg5: memref<1x128xf32, #tpu.memory_space<vmem>>, %arg6: memref<8x128xf32, #tpu.memory_space<vmem>>) attributes {dimension_semantics = [#tpu.dimension_semantics<parallel>], iteration_bounds = array<i64: 1>, scalar_prefetch = 0 : i64, scratch_operands = 0 : i64, tpu.core_type = #tpu.core_type<tc>, window_params = [{transform_indices = @transform_0, window_bounds = array<i64: 8, 1024>}, {pipeline_mode = #tpu.pipeline_mode<synchronous>, transform_indices = @transform_1, window_bounds = array<i64: 1024, 128>}, {pipeline_mode = #tpu.pipeline_mode<synchronous>, transform_indices = @transform_2, window_bounds = array<i64: 1, 128>}, {pipeline_mode = #tpu.pipeline_mode<synchronous>, transform_indices = @transform_3, window_bounds = array<i64: 128, 128>}, {pipeline_mode = #tpu.pipeline_mode<synchronous>, transform_indices = @transform_4, window_bounds = array<i64: 1, 128>}, {transform_indices = @transform_5, window_bounds = array<i64: 8, 128>}]} {
    %c0 = arith.constant 0 : index
    %c0_0 = arith.constant 0 : index
    %0 = vector.load %arg1[%c0, %c0_0] : memref<8x1024xf32, #tpu.memory_space<vmem>>, vector<8x1024xf32>
    %c0_1 = arith.constant 0 : index
    %c0_2 = arith.constant 0 : index
    %1 = vector.load %arg2[%c0_1, %c0_2] : memref<1024x128xf32, #tpu.memory_space<vmem>>, vector<1024x128xf32>
    %cst = arith.constant dense<0.000000e+00> : vector<8x128xf32>
    %2 = tpu.matmul %0, %1, %cst {dimension_numbers = #tpu.dot_dimension_numbers<[1], [0], [0], [1], [0, 0, 1, 1], [], []>} : vector<8x1024xf32>, vector<1024x128xf32>, vector<8x128xf32> -> vector<8x128xf32>
    %c0_3 = arith.constant 0 : index
    %c0_4 = arith.constant 0 : index
    %3 = vector.load %arg3[%c0_3, %c0_4] : memref<1x128xf32, #tpu.memory_space<vmem>>, vector<1x128xf32>
    %4 = vector.broadcast %3 : vector<1x128xf32> to vector<8x128xf32>
    %5 = arith.addf %2, %4 : vector<8x128xf32>
    %cst_5 = arith.constant 0.000000e+00 : f32
    %6 = vector.broadcast %cst_5 : f32 to vector<8x128xf32>
    %7 = arith.maximumf %5, %6 : vector<8x128xf32>
    %c0_6 = arith.constant 0 : index
    %c0_7 = arith.constant 0 : index
    %8 = vector.load %arg4[%c0_6, %c0_7] : memref<128x128xf32, #tpu.memory_space<vmem>>, vector<128x128xf32>
    %cst_8 = arith.constant dense<0.000000e+00> : vector<8x128xf32>
    %9 = tpu.matmul %7, %8, %cst_8 {dimension_numbers = #tpu.dot_dimension_numbers<[1], [0], [0], [1], [0, 0, 1, 1], [], []>} : vector<8x128xf32>, vector<128x128xf32>, vector<8x128xf32> -> vector<8x128xf32>
    %c0_9 = arith.constant 0 : index
    %c0_10 = arith.constant 0 : index
    %10 = vector.load %arg5[%c0_9, %c0_10] : memref<1x128xf32, #tpu.memory_space<vmem>>, vector<1x128xf32>
    %11 = vector.broadcast %10 : vector<1x128xf32> to vector<8x128xf32>
    %12 = arith.addf %9, %11 : vector<8x128xf32>
    %c0_11 = arith.constant 0 : index
    %c0_12 = arith.constant 0 : index
    %13 = vector.load %arg6[%c0_11, %c0_12] : memref<8x128xf32, #tpu.memory_space<vmem>>, vector<8x128xf32>
    tpu.vector_store %arg6[%c0_11, %c0_12], %12 {strides = array<i32>} : memref<8x128xf32, #tpu.memory_space<vmem>>, vector<8x128xf32>,
    return
  }
  func.func @transform_0(%arg0: i32) -> (i32, i32) {
    %c0_i32 = arith.constant 0 : i32
    %c0_i32_0 = arith.constant 0 : i32
    return %arg0, %c0_i32 : i32, i32
  }
  func.func @transform_1(%arg0: i32) -> (i32, i32) {
    %c0_i32 = arith.constant 0 : i32
    %c0_i32_0 = arith.constant 0 : i32
    %c0_i32_1 = arith.constant 0 : i32
    return %c0_i32, %c0_i32_0 : i32, i32
  }
  func.func @transform_2(%arg0: i32) -> (i32, i32) {
    %c0_i32 = arith.constant 0 : i32
    %c0_i32_0 = arith.constant 0 : i32
    %c0_i32_1 = arith.constant 0 : i32
    return %c0_i32, %c0_i32_0 : i32, i32
  }
  func.func @transform_3(%arg0: i32) -> (i32, i32) {
    %c0_i32 = arith.constant 0 : i32
    %c0_i32_0 = arith.constant 0 : i32
    %c0_i32_1 = arith.constant 0 : i32
    return %c0_i32, %c0_i32_0 : i32, i32
  }
  func.func @transform_4(%arg0: i32) -> (i32, i32) {
    %c0_i32 = arith.constant 0 : i32
    %c0_i32_0 = arith.constant 0 : i32
    %c0_i32_1 = arith.constant 0 : i32
    return %c0_i32, %c0_i32_0 : i32, i32
  }
  func.func @transform_5(%arg0: i32) -> (i32, i32) {
    %c0_i32 = arith.constant 0 : i32
    %c0_i32_0 = arith.constant 0 : i32
    return %arg0, %c0_i32 : i32, i32
  }
}

</mosaic_0001>

<bundles_post_ra>
// kernel: tpu_custom_call.1
= control target key start
LH: loop header
LB: loop body
LE: loop exit
PB: predicated region body
PF: predicated region fallthrough
CT: control target
= control target key end

     0   :  { %10 = vsyncpa [#allocation3], 0  ;;  %s938_s0 = inlined_call_operand.hbm [shape: f32[8,1024], index: 0, kind: input, shape index: {}]   ;;  %s939_s1 = inlined_call_operand.hbm [shape: f32[1024,128], index: 1, kind: input, shape index: {}]   ;;  %s940_s2 = inlined_call_operand.vmem [shape: f32[1,128], index: 2, kind: input, shape index: {}]   ;;  %s941_s3 = inlined_call_operand.hbm [shape: f32[128,128], index: 3, kind: input, shape index: {}]   ;;  %s942_s4 = inlined_call_operand.vmem [shape: f32[1,128], index: 4, kind: input, shape index: {}]   ;;  %s943_s5 = inlined_call_operand.hbm [shape: f32[8,128], index: 5, kind: output, shape index: {}]  }
   0x1   :  { %11 = vsyncpa [#allocation6], 0 }
   0x2   :  { %12 = vsyncpa [#allocation4], 0  ;;  %s882_s18 = smov [#allocation5]  }
   0x3   :  { %s28_s19 = sshll.u32 %s882_s18, 4  ;;  %s29_s19 = int_to_ptr.vmem [resolvable:$true] %s28_s19 }
   0x4   :  { %s804_s20 = scalar_lea.vmem %s29_s19, 16384  ;;  %p809_p1 = scmp.lt.s32.totalorder %s29_s19, %s29_s19 }
   0x5   :  { %p805_p0 = scmp.ne.s32.totalorder %s29_s19, %s804_s20  ;;  %p810_p2 = scmp.lt.s32.totalorder %s804_s20, %s804_s20 }
   0x7   :  { %p811_p3 = por %p810_p2, %p809_p1 }
   0x9   :  { %p812_p4 = pnand %p811_p3, %p805_p0 }
   0xb   :  { %815 = shalt.err (!%p812_p4)
}
   0xc   :  { %s883_s21 = smov 128   ;;  %s884_s22 = smov 8  }
   0xd   :  { %34 = dma.hbm_to_vmem [thread:$0]  %s939_s1, 16384, %s29_s19, [#allocation6], %s883_s21, %s883_s21, %s884_s22  }
   0xe   :  { %s885_s25 = smov [#allocation2]   ;;  %s886_s27 = smov [#allocation7]  }
   0xf   :  { %s19_s26 = sshll.u32 %s885_s25, 4  ;;  %s42_s28 = sshll.u32 %s886_s27, 4  ;;  %s20_s26 = int_to_ptr.vmem [resolvable:$true] %s19_s26  ;;  %s43_s28 = int_to_ptr.vmem [resolvable:$true] %s42_s28 }
  0x10   :  { %s824_s29 = scalar_lea.vmem %s20_s26, 1024  ;;  %p829_p6 = scmp.lt.s32.totalorder %s20_s26, %s20_s26 }
  0x11   :  { %p825_p5 = scmp.ne.s32.totalorder %s20_s26, %s824_s29  ;;  %p830_p7 = scmp.lt.s32.totalorder %s824_s29, %s824_s29 }
  0x13   :  { %p831_p8 = por %p830_p7, %p829_p6 }
  0x15   :  { %p832_p9 = pnand %p831_p8, %p825_p5 }
  0x17   :  { %835 = shalt.err (!%p832_p9)
}
  0x18   :  { %22 = dma.hbm_to_vmem [thread:$0]  %s938_s0, 1024, %s20_s26, [#allocation3]  }
  0x19   :  { %s844_s7 = scalar_lea.vmem %s43_s28, 2048  ;;  %p849_p11 = scmp.lt.s32.totalorder %s43_s28, %s43_s28 }
  0x1a   :  { %p845_p10 = scmp.ne.s32.totalorder %s43_s28, %s844_s7  ;;  %p850_p12 = scmp.lt.s32.totalorder %s844_s7, %s844_s7 }
  0x1c   :  { %p851_p13 = por %p850_p12, %p849_p11 }
  0x1e   :  { %p852_p0 = pnand %p851_p13, %p845_p10 }
  0x20   :  { %855 = shalt.err (!%p852_p0)
}
  0x21   :  { %48 = dma.hbm_to_vmem [thread:$0]  %s941_s3, 2048, %s43_s28, [#allocation6], %s883_s21, %s883_s21, %s884_s22  }
  0x22   :  { %876 = dma.done.wait [#allocation3], 1024  }
  0x23   :  { %877 = vsyncadd [#allocation3], 4294966272 }
  0x24   :  { %878 = dma.done.wait [#allocation6], 18432  }
  0x25   :  { %879 = vsyncadd [#allocation6], 4294948864  ;;  %v99_v0 = vld [vmem:[#allocation5 + $0xf8] sm:$0xff]  ;;  %v98_v4 = vld [vmem:[#allocation5 + $0xf0] sm:$0xff]  ;;  %vm888_vm0 = vmmov 0   ;;  %s889_s11 = smov [#allocation8]  }
  0x26   :  { %v131_v1 = vld [vmem:[#allocation5 + $0x1f8] sm:$0xff]  ;;  %596 = vmatprep.subr.mxu0 %v99_v0  ;;  %v130_v5 = vld [vmem:[#allocation5 + $0x1f0] sm:$0xff]  ;;  %v97_v8 = vld [vmem:[#allocation5 + $0xe8] sm:$0xff] }
  0x27   :  { %v83_v2 = vld [vmem:[#allocation5 + $0x78] sm:$0xff]  ;;  %631 = vmatprep.subr.mxu1 %v131_v1  ;;  %v82_v6 = vld [vmem:[#allocation5 + $0x70] sm:$0xff]  ;;  %v129_v9 = vld [vmem:[#allocation5 + $0x1e8] sm:$0xff] }
  0x28   :  { %v115_v3 = vld [vmem:[#allocation5 + $0x178] sm:$0xff]  ;;  %597 = vmatpush3.msra.mxu0 %v83_v2  ;;  %v114_v7 = vld [vmem:[#allocation5 + $0x170] sm:$0xff]  ;;  %v81_v10 = vld [vmem:[#allocation5 + $0x68] sm:$0xff] }
  0x29   :  { %632 = vmatpush3.msra.mxu1 %v115_v3  ;;  %598 = vmatprep.subr.mxu0 %v98_v4  ;;  %v113_v11 = vld [vmem:[#allocation5 + $0x168] sm:$0xff]  ;;  %v96_v12 = vld [vmem:[#allocation5 + $0xe0] sm:$0xff]  ;;  %v95_v16 = vld [vmem:[#allocation5 + $0xd8] sm:$0xff] }
  0x2a   :  { %633 = vmatprep.subr.mxu1 %v130_v5  ;;  %599 = vmatpush3.msra.mxu0 %v82_v6  ;;  %v128_v13 = vld [vmem:[#allocation5 + $0x1e0] sm:$0xff]  ;;  %v127_v17 = vld [vmem:[#allocation5 + $0x1d8] sm:$0xff]  ;;  %v94_v20 = vld [vmem:[#allocation5 + $0xd0] sm:$0xff] }
  0x2b   :  { %634 = vmatpush3.msra.mxu1 %v114_v7  ;;  %600 = vmatprep.subr.mxu0 %v97_v8  ;;  %v80_v14 = vld [vmem:[#allocation5 + $0x60] sm:$0xff]  ;;  %v79_v18 = vld [vmem:[#allocation5 + $0x58] sm:$0xff]  ;;  %v126_v21 = vld [vmem:[#allocation5 + $0x1d0] sm:$0xff] }
  0x2c   :  { %635 = vmatprep.subr.mxu1 %v129_v9  ;;  %v112_v15 = vld [vmem:[#allocation5 + $0x160] sm:$0xff]  ;;  %601 = vmatpush3.msra.mxu0 %v81_v10  ;;  %v111_v19 = vld [vmem:[#allocation5 + $0x158] sm:$0xff]  ;;  %v78_v22 = vld [vmem:[#allocation5 + $0x50] sm:$0xff] }
  0x2d   :  { %636 = vmatpush3.msra.mxu1 %v113_v11  ;;  %602 = vmatprep.subr.mxu0 %v96_v12  ;;  %v110_v23 = vld [vmem:[#allocation5 + $0x150] sm:$0xff]  ;;  %v93_v24 = vld [vmem:[#allocation5 + $0xc8] sm:$0xff]  ;;  %v92_v28 = vld [vmem:[#allocation5 + $0xc0] sm:$0xff] }
  0x2e   :  { %637 = vmatprep.subr.mxu1 %v128_v13  ;;  %603 = vmatpush3.msra.mxu0 %v80_v14  ;;  %v125_v25 = vld [vmem:[#allocation5 + $0x1c8] sm:$0xff]  ;;  %v124_v29 = vld [vmem:[#allocation5 + $0x1c0] sm:$0xff]  ;;  %v91_v32 = vld [vmem:[#allocation5 + $0xb8] sm:$0xff] }
  0x2f   :  { %638 = vmatpush3.msra.mxu1 %v112_v15  ;;  %604 = vmatprep.subr.mxu0 %v95_v16  ;;  %v77_v26 = vld [vmem:[#allocation5 + $0x48] sm:$0xff]  ;;  %v76_v30 = vld [vmem:[#allocation5 + $0x40] sm:$0xff]  ;;  %v123_v33 = vld [vmem:[#allocation5 + $0x1b8] sm:$0xff] }
  0x30   :  { %639 = vmatprep.subr.mxu1 %v127_v17  ;;  %605 = vmatpush3.msra.mxu0 %v79_v18  ;;  %v109_v27 = vld [vmem:[#allocation5 + $0x148] sm:$0xff]  ;;  %v108_v31 = vld [vmem:[#allocation5 + $0x140] sm:$0xff]  ;;  %v75_v34 = vld [vmem:[#allocation5 + $0x38] sm:$0xff] }
  0x31   :  { %640 = vmatpush3.msra.mxu1 %v111_v19  ;;  %606 = vmatprep.subr.mxu0 %v94_v20  ;;  %v107_v35 = vld [vmem:[#allocation5 + $0x138] sm:$0xff]  ;;  %v90_v36 = vld [vmem:[#allocation5 + $0xb0] sm:$0xff]  ;;  %v89_v40 = vld [vmem:[#allocation5 + $0xa8] sm:$0xff] }
  0x32   :  { %641 = vmatprep.subr.mxu1 %v126_v21  ;;  %607 = vmatpush3.msra.mxu0 %v78_v22  ;;  %v122_v37 = vld [vmem:[#allocation5 + $0x1b0] sm:$0xff]  ;;  %v121_v41 = vld [vmem:[#allocation5 + $0x1a8] sm:$0xff]  ;;  %v88_v44 = vld [vmem:[#allocation5 + $0xa0] sm:$0xff] }
  0x33   :  { %642 = vmatpush3.msra.mxu1 %v110_v23  ;;  %608 = vmatprep.subr.mxu0 %v93_v24  ;;  %v74_v38 = vld [vmem:[#allocation5 + $0x30] sm:$0xff]  ;;  %v73_v42 = vld [vmem:[#allocation5 + $0x28] sm:$0xff]  ;;  %v120_v45 = vld [vmem:[#allocation5 + $0x1a0] sm:$0xff] }
  0x34   :  { %643 = vmatprep.subr.mxu1 %v125_v25  ;;  %609 = vmatpush3.msra.mxu0 %v77_v26  ;;  %v106_v39 = vld [vmem:[#allocation5 + $0x130] sm:$0xff]  ;;  %v105_v43 = vld [vmem:[#allocation5 + $0x128] sm:$0xff]  ;;  %v72_v46 = vld [vmem:[#allocation5 + $0x20] sm:$0xff] }
  0x35   :  { %644 = vmatpush3.msra.mxu1 %v109_v27  ;;  %610 = vmatprep.subr.mxu0 %v92_v28  ;;  %v104_v47 = vld [vmem:[#allocation5 + $0x120] sm:$0xff]  ;;  %v87_v48 = vld [vmem:[#allocation5 + $0x98] sm:$0xff]  ;;  %v86_v52 = vld [vmem:[#allocation5 + $0x90] sm:$0xff] }
  0x36   :  { %645 = vmatprep.subr.mxu1 %v124_v29  ;;  %611 = vmatpush3.msra.mxu0 %v76_v30  ;;  %v119_v49 = vld [vmem:[#allocation5 + $0x198] sm:$0xff]  ;;  %v118_v53 = vld [vmem:[#allocation5 + $0x190] sm:$0xff]  ;;  %v85_v56 = vld [vmem:[#allocation5 + $0x88] sm:$0xff] }
  0x37   :  { %646 = vmatpush3.msra.mxu1 %v108_v31  ;;  %612 = vmatprep.subr.mxu0 %v91_v32  ;;  %v71_v50 = vld [vmem:[#allocation5 + $0x18] sm:$0xff]  ;;  %v70_v54 = vld [vmem:[#allocation5 + $0x10] sm:$0xff]  ;;  %v117_v57 = vld [vmem:[#allocation5 + $0x188] sm:$0xff] }
  0x38   :  { %647 = vmatprep.subr.mxu1 %v123_v33  ;;  %613 = vmatpush3.msra.mxu0 %v75_v34  ;;  %v103_v51 = vld [vmem:[#allocation5 + $0x118] sm:$0xff]  ;;  %v102_v55 = vld [vmem:[#allocation5 + $0x110] sm:$0xff]  ;;  %v69_v58 = vld [vmem:[#allocation5 + $0x8] sm:$0xff] }
  0x39   :  { %648 = vmatpush3.msra.mxu1 %v107_v35  ;;  %614 = vmatprep.subr.mxu0 %v90_v36  ;;  %v101_v59 = vld [vmem:[#allocation5 + $0x108] sm:$0xff]  ;;  %v84_v60 = vld [vmem:[#allocation5 + $0x80] sm:$0xff]  ;;  %v63_v2 = vld [vmem:[#allocation2 + $0x18] sm:$0xff] }
  0x3a   :  { %649 = vmatprep.subr.mxu1 %v122_v37  ;;  %615 = vmatpush3.msra.mxu0 %v74_v38  ;;  %v116_v61 = vld [vmem:[#allocation5 + $0x180] sm:$0xff]  ;;  %v61_v63 = vld [vmem:[#allocation2 + $0x8] sm:$0xff]  ;;  %v163_v3 = vld [vmem:[#allocation5 + $0x2f8] sm:$0xff] }
  0x3b   :  { %650 = vmatpush3.msra.mxu1 %v106_v39  ;;  %616 = vmatprep.subr.mxu0 %v89_v40  ;;  %v68_v62 = vld [vmem:[#allocation5] sm:$0xff]  ;;  %v195_v4 = vld [vmem:[#allocation5 + $0x3f8] sm:$0xff]  ;;  %v62_v5 = vld [vmem:[#allocation2 + $0x10] sm:$0xff] }
  0x3c   :  { %651 = vmatprep.subr.mxu1 %v121_v41  ;;  %617 = vmatpush3.msra.mxu0 %v73_v42  ;;  %v100_v0 = vld [vmem:[#allocation5 + $0x100] sm:$0xff]  ;;  %v147_v6 = vld [vmem:[#allocation5 + $0x278] sm:$0xff]  ;;  %v162_v8 = vld [vmem:[#allocation5 + $0x2f0] sm:$0xff] }
  0x3d   :  { %652 = vmatpush3.msra.mxu1 %v105_v43  ;;  %618 = vmatprep.subr.mxu0 %v88_v44  ;;  %v60_v1 = vld [vmem:[#allocation2] sm:$0xff]  ;;  %v179_v7 = vld [vmem:[#allocation5 + $0x378] sm:$0xff]  ;;  %v194_v9 = vld [vmem:[#allocation5 + $0x3f0] sm:$0xff] }
  0x3e   :  { %653 = vmatprep.subr.mxu1 %v120_v45  ;;  %619 = vmatpush3.msra.mxu0 %v72_v46  ;;  %v146_v10 = vld [vmem:[#allocation5 + $0x270] sm:$0xff]  ;;  %v161_v12 = vld [vmem:[#allocation5 + $0x2e8] sm:$0xff]  ;;  %v160_v16 = vld [vmem:[#allocation5 + $0x2e0] sm:$0xff] }
  0x3f   :  { %654 = vmatpush3.msra.mxu1 %v104_v47  ;;  %620 = vmatprep.subr.mxu0 %v87_v48  ;;  %v178_v11 = vld [vmem:[#allocation5 + $0x370] sm:$0xff]  ;;  %v193_v13 = vld [vmem:[#allocation5 + $0x3e8] sm:$0xff]  ;;  %v192_v17 = vld [vmem:[#allocation5 + $0x3e0] sm:$0xff] }
  0x40   :  { %655 = vmatprep.subr.mxu1 %v119_v49  ;;  %621 = vmatpush3.msra.mxu0 %v71_v50  ;;  %v145_v14 = vld [vmem:[#allocation5 + $0x268] sm:$0xff]  ;;  %v144_v18 = vld [vmem:[#allocation5 + $0x260] sm:$0xff]  ;;  %v159_v20 = vld [vmem:[#allocation5 + $0x2d8] sm:$0xff] }
  0x41   :  { %656 = vmatpush3.msra.mxu1 %v103_v51  ;;  %622 = vmatprep.subr.mxu0 %v86_v52  ;;  %v177_v15 = vld [vmem:[#allocation5 + $0x368] sm:$0xff]  ;;  %v176_v19 = vld [vmem:[#allocation5 + $0x360] sm:$0xff]  ;;  %v191_v21 = vld [vmem:[#allocation5 + $0x3d8] sm:$0xff] }
  0x42   :  { %657 = vmatprep.subr.mxu1 %v118_v53  ;;  %623 = vmatpush3.msra.mxu0 %v70_v54  ;;  %v143_v22 = vld [vmem:[#allocation5 + $0x258] sm:$0xff]  ;;  %v158_v24 = vld [vmem:[#allocation5 + $0x2d0] sm:$0xff]  ;;  %v157_v28 = vld [vmem:[#allocation5 + $0x2c8] sm:$0xff] }
  0x43   :  { %658 = vmatpush3.msra.mxu1 %v102_v55  ;;  %624 = vmatprep.subr.mxu0 %v85_v56  ;;  %v175_v23 = vld [vmem:[#allocation5 + $0x358] sm:$0xff]  ;;  %v190_v25 = vld [vmem:[#allocation5 + $0x3d0] sm:$0xff]  ;;  %v189_v29 = vld [vmem:[#allocation5 + $0x3c8] sm:$0xff] }
  0x44   :  { %659 = vmatprep.subr.mxu1 %v117_v57  ;;  %625 = vmatpush3.msra.mxu0 %v69_v58  ;;  %v142_v26 = vld [vmem:[#allocation5 + $0x250] sm:$0xff]  ;;  %v141_v30 = vld [vmem:[#allocation5 + $0x248] sm:$0xff]  ;;  %v156_v32 = vld [vmem:[#allocation5 + $0x2c0] sm:$0xff] }
  0x45   :  { %660 = vmatpush3.msra.mxu1 %v101_v59  ;;  %626 = vmatprep.subr.mxu0 %v84_v60  ;;  %v174_v27 = vld [vmem:[#allocation5 + $0x350] sm:$0xff]  ;;  %v173_v31 = vld [vmem:[#allocation5 + $0x348] sm:$0xff]  ;;  %v188_v33 = vld [vmem:[#allocation5 + $0x3c0] sm:$0xff] }
  0x46   :  { %661 = vmatprep.subr.mxu1 %v116_v61  ;;  %627 = vmatpush3.msra.mxu0 %v68_v62  ;;  %v140_v34 = vld [vmem:[#allocation5 + $0x240] sm:$0xff]  ;;  %v155_v36 = vld [vmem:[#allocation5 + $0x2b8] sm:$0xff]  ;;  %v154_v40 = vld [vmem:[#allocation5 + $0x2b0] sm:$0xff] }
  0x47   :  { %267 = vmatprep.mubr.f32.mxu0 %v61_v63  ;;  %662 = vmatpush3.msra.mxu1 %v100_v0  ;;  %v172_v35 = vld [vmem:[#allocation5 + $0x340] sm:$0xff]  ;;  %v187_v37 = vld [vmem:[#allocation5 + $0x3b8] sm:$0xff]  ;;  %v186_v41 = vld [vmem:[#allocation5 + $0x3b0] sm:$0xff] }
  0x48   :  { %268 = vmatmul.mubr.f32.vlgmr.msra.gmra.mxu0 %v60_v1  ;;  %337 = vmatprep.mubr.f32.mxu1 %v63_v2  ;;  %v139_v38 = vld [vmem:[#allocation5 + $0x238] sm:$0xff]  ;;  %v138_v42 = vld [vmem:[#allocation5 + $0x230] sm:$0xff]  ;;  %v153_v44 = vld [vmem:[#allocation5 + $0x2a8] sm:$0xff] }
  0x49   :  { %666 = vmatprep.subr.mxu0 %v163_v3  ;;  %701 = vmatprep.subr.mxu1 %v195_v4  ;;  %v171_v39 = vld [vmem:[#allocation5 + $0x338] sm:$0xff]  ;;  %v170_v43 = vld [vmem:[#allocation5 + $0x330] sm:$0xff]  ;;  %v185_v45 = vld [vmem:[#allocation5 + $0x3a8] sm:$0xff] }
  0x4a   :  { %338 = vmatmul.mubr.f32.vlgmr.msra.gmra.mxu1 %v62_v5  ;;  %667 = vmatpush3.msra.mxu0 %v147_v6  ;;  %v137_v46 = vld [vmem:[#allocation5 + $0x228] sm:$0xff]  ;;  %v152_v48 = vld [vmem:[#allocation5 + $0x2a0] sm:$0xff]  ;;  %v151_v52 = vld [vmem:[#allocation5 + $0x298] sm:$0xff] }
  0x4b   :  { %702 = vmatpush3.msra.mxu1 %v179_v7  ;;  %668 = vmatprep.subr.mxu0 %v162_v8  ;;  %v169_v47 = vld [vmem:[#allocation5 + $0x328] sm:$0xff]  ;;  %v184_v49 = vld [vmem:[#allocation5 + $0x3a0] sm:$0xff]  ;;  %v183_v53 = vld [vmem:[#allocation5 + $0x398] sm:$0xff] }
  0x4c   :  { %703 = vmatprep.subr.mxu1 %v194_v9  ;;  %669 = vmatpush3.msra.mxu0 %v146_v10  ;;  %v136_v50 = vld [vmem:[#allocation5 + $0x220] sm:$0xff]  ;;  %v135_v54 = vld [vmem:[#allocation5 + $0x218] sm:$0xff]  ;;  %v150_v56 = vld [vmem:[#allocation5 + $0x290] sm:$0xff]  ;;  %v887_v9 = vmov 0.0  }
  0x4d   :  { %704 = vmatpush3.msra.mxu1 %v178_v11  ;;  %670 = vmatprep.subr.mxu0 %v161_v12  ;;  %v168_v51 = vld [vmem:[#allocation5 + $0x320] sm:$0xff]  ;;  %v167_v55 = vld [vmem:[#allocation5 + $0x318] sm:$0xff]  ;;  %v182_v57 = vld [vmem:[#allocation5 + $0x390] sm:$0xff] }
  0x4e   :  { %705 = vmatprep.subr.mxu1 %v193_v13  ;;  %671 = vmatpush3.msra.mxu0 %v145_v14  ;;  %v134_v58 = vld [vmem:[#allocation5 + $0x210] sm:$0xff]  ;;  %v149_v60 = vld [vmem:[#allocation5 + $0x288] sm:$0xff]  ;;  %v148_v0 = vld [vmem:[#allocation5 + $0x280] sm:$0xff] }
  0x4f   :  { %706 = vmatpush3.msra.mxu1 %v177_v15  ;;  %672 = vmatprep.subr.mxu0 %v160_v16  ;;  %v166_v59 = vld [vmem:[#allocation5 + $0x310] sm:$0xff]  ;;  %v181_v61 = vld [vmem:[#allocation5 + $0x388] sm:$0xff]  ;;  %v180_v1 = vld [vmem:[#allocation5 + $0x380] sm:$0xff] }
  0x50   :  { %707 = vmatprep.subr.mxu1 %v192_v17  ;;  %673 = vmatpush3.msra.mxu0 %v144_v18  ;;  %v133_v62 = vld [vmem:[#allocation5 + $0x208] sm:$0xff]  ;;  %v132_v2 = vld [vmem:[#allocation5 + $0x200] sm:$0xff]  ;;  %v67_v5 = vld [vmem:[#allocation2 + $0x38] sm:$0xff] }
  0x51   :  { %708 = vmatpush3.msra.mxu1 %v176_v19  ;;  %674 = vmatprep.subr.mxu0 %v159_v20  ;;  %v165_v63 = vld [vmem:[#allocation5 + $0x308] sm:$0xff]  ;;  %v164_v4 = vld [vmem:[#allocation5 + $0x300] sm:$0xff]  ;;  %v66_v7 = vld [vmem:[#allocation2 + $0x30] sm:$0xff] }
  0x52   :  { %709 = vmatprep.subr.mxu1 %v191_v21  ;;  %675 = vmatpush3.msra.mxu0 %v143_v22  ;;  %v65_v3 = vld [vmem:[#allocation2 + $0x28] sm:$0xff]  ;;  %v64_v6 = vld [vmem:[#allocation2 + $0x20] sm:$0xff]  ;;  %v499_v8 = vld [vmem:[#allocation7 + $0x78] sm:$0xff] }
  0x53   :  { %710 = vmatpush3.msra.mxu1 %v175_v23  ;;  %676 = vmatprep.subr.mxu0 %v158_v24  ;;  %v498_v10 = vld [vmem:[#allocation7 + $0x70] sm:$0xff]  ;;  %v497_v11 = vld [vmem:[#allocation7 + $0x68] sm:$0xff]  ;;  %v496_v12 = vld [vmem:[#allocation7 + $0x60] sm:$0xff] }
  0x54   :  { %711 = vmatprep.subr.mxu1 %v190_v25  ;;  %677 = vmatpush3.msra.mxu0 %v142_v26  ;;  %v495_v13 = vld [vmem:[#allocation7 + $0x58] sm:$0xff]  ;;  %v494_v14 = vld [vmem:[#allocation7 + $0x50] sm:$0xff]  ;;  %v493_v15 = vld [vmem:[#allocation7 + $0x48] sm:$0xff] }
  0x55   :  { %712 = vmatpush3.msra.mxu1 %v174_v27  ;;  %678 = vmatprep.subr.mxu0 %v157_v28  ;;  %v492_v16 = vld [vmem:[#allocation7 + $0x40] sm:$0xff]  ;;  %v491_v17 = vld [vmem:[#allocation7 + $0x38] sm:$0xff]  ;;  %v490_v18 = vld [vmem:[#allocation7 + $0x30] sm:$0xff] }
  0x56   :  { %713 = vmatprep.subr.mxu1 %v189_v29  ;;  %679 = vmatpush3.msra.mxu0 %v141_v30  ;;  %v489_v19 = vld [vmem:[#allocation7 + $0x28] sm:$0xff]  ;;  %v488_v20 = vld [vmem:[#allocation7 + $0x20] sm:$0xff]  ;;  %v487_v21 = vld [vmem:[#allocation7 + $0x18] sm:$0xff] }
  0x57   :  { %714 = vmatpush3.msra.mxu1 %v173_v31  ;;  %680 = vmatprep.subr.mxu0 %v156_v32  ;;  %v486_v22 = vld [vmem:[#allocation7 + $0x10] sm:$0xff]  ;;  %v485_v23 = vld [vmem:[#allocation7 + $0x8] sm:$0xff]  ;;  %v484_v24 = vld [vmem:[#allocation7] sm:$0xff] }
  0x58   :  { %715 = vmatprep.subr.mxu1 %v188_v33  ;;  %681 = vmatpush3.msra.mxu0 %v140_v34  ;;  %v594_v29 = vld [vmem:[%s940_s2] ss:$0 sm:$0xff]  ;;  %s584_s2 = sshll.u32 %s889_s11, 4  ;;  %s585_s2 = int_to_ptr.vmem [resolvable:$true] %s584_s2 }
  0x59   :  { %716 = vmatpush3.msra.mxu1 %v172_v35  ;;  %682 = vmatprep.subr.mxu0 %v155_v36  ;;  %s856_s12 = scalar_lea.vmem %s585_s2, 128  ;;  %p861_p2 = scmp.lt.s32.totalorder %s585_s2, %s585_s2 }
  0x5a   :  { %717 = vmatprep.subr.mxu1 %v187_v37  ;;  %683 = vmatpush3.msra.mxu0 %v139_v38  ;;  %p857_p1 = scmp.ne.s32.totalorder %s585_s2, %s856_s12  ;;  %p862_p3 = scmp.lt.s32.totalorder %s856_s12, %s856_s12 }
  0x5b   :  { %718 = vmatpush3.msra.mxu1 %v171_v39  ;;  %684 = vmatprep.subr.mxu0 %v154_v40 }
  0x5c   :  { %719 = vmatprep.subr.mxu1 %v186_v41  ;;  %685 = vmatpush3.msra.mxu0 %v138_v42  ;;  %p863_p4 = por %p862_p3, %p861_p2 }
  0x5d   :  { %720 = vmatpush3.msra.mxu1 %v170_v43  ;;  %686 = vmatprep.subr.mxu0 %v153_v44  ;;  %v595_v43 = vld [vmem:[%s942_s4] ss:$0 sm:$0xff] }
  0x5e   :  { %721 = vmatprep.subr.mxu1 %v185_v45  ;;  %687 = vmatpush3.msra.mxu0 %v137_v46  ;;  %p864_p5 = pnand %p863_p4, %p857_p1 }
  0x5f   :  { %722 = vmatpush3.msra.mxu1 %v169_v47  ;;  %688 = vmatprep.subr.mxu0 %v152_v48 }
  0x60   :  { %723 = vmatprep.subr.mxu1 %v184_v49  ;;  %689 = vmatpush3.msra.mxu0 %v136_v50 }
  0x61   :  { %724 = vmatpush3.msra.mxu1 %v168_v51  ;;  %690 = vmatprep.subr.mxu0 %v151_v52 }
  0x62   :  { %725 = vmatprep.subr.mxu1 %v183_v53  ;;  %691 = vmatpush3.msra.mxu0 %v135_v54 }
  0x63   :  { %726 = vmatpush3.msra.mxu1 %v167_v55  ;;  %692 = vmatprep.subr.mxu0 %v150_v56 }
  0x64   :  { %727 = vmatprep.subr.mxu1 %v182_v57  ;;  %693 = vmatpush3.msra.mxu0 %v134_v58 }
  0x65   :  { %728 = vmatpush3.msra.mxu1 %v166_v59  ;;  %694 = vmatprep.subr.mxu0 %v149_v60 }
  0x66   :  { %729 = vmatprep.subr.mxu1 %v181_v61  ;;  %695 = vmatpush3.msra.mxu0 %v133_v62 }
  0x67   :  { %730 = vmatpush3.msra.mxu1 %v165_v63  ;;  %696 = vmatprep.subr.mxu0 %v148_v0 }
  0x68   :  { %731 = vmatprep.subr.mxu1 %v180_v1  ;;  %697 = vmatpush3.msra.mxu0 %v132_v2 }
  0x69   :  { %407 = vmatprep.mubr.f32.mxu0 %v65_v3  ;;  %732 = vmatpush3.msra.mxu1 %v164_v4 }
  0x6a   :  { %477 = vmatprep.mubr.f32.mxu1 %v67_v5  ;;  %408 = vmatmul.mubr.f32.vlgmr.msra.gmra.mxu0 %v64_v6 }
  0x6b   :  { %478 = vmatmul.mubr.f32.vlgmr.msra.gmra.mxu1 %v66_v7  ;;  %753 = vmatprep.subr.mxu0 %v887_v9 }
  0x6c   :  { %754 = vmatpush3.msra.mxu0 %v499_v8  ;;  %785 = vmatprep.mubr.msk.f32.mxu0 %vm888_vm0, %v887_v9 }
  0x6d   :  { %755 = vmatprep.subr.mxu0 %v887_v9 }
  0x6e   :  { %756 = vmatpush3.msra.mxu0 %v498_v10 }
  0x6f   :  { %757 = vmatprep.subr.mxu0 %v887_v9 }
  0x70   :  { %758 = vmatpush3.msra.mxu0 %v497_v11 }
  0x71   :  { %759 = vmatprep.subr.mxu0 %v887_v9 }
  0x72   :  { %760 = vmatpush3.msra.mxu0 %v496_v12 }
  0x73   :  { %761 = vmatprep.subr.mxu0 %v887_v9 }
  0x74   :  { %762 = vmatpush3.msra.mxu0 %v495_v13 }
  0x75   :  { %763 = vmatprep.subr.mxu0 %v887_v9 }
  0x76   :  { %764 = vmatpush3.msra.mxu0 %v494_v14 }
  0x77   :  { %765 = vmatprep.subr.mxu0 %v887_v9 }
  0x78   :  { %766 = vmatpush3.msra.mxu0 %v493_v15 }
  0x79   :  { %767 = vmatprep.subr.mxu0 %v887_v9 }
  0x7a   :  { %768 = vmatpush3.msra.mxu0 %v492_v16 }
  0x7b   :  { %769 = vmatprep.subr.mxu0 %v887_v9 }
  0x7c   :  { %770 = vmatpush3.msra.mxu0 %v491_v17 }
  0x7d   :  { %771 = vmatprep.subr.mxu0 %v887_v9 }
  0x7e   :  { %772 = vmatpush3.msra.mxu0 %v490_v18 }
  0x7f   :  { %773 = vmatprep.subr.mxu0 %v887_v9 }
  0x80   :  { %774 = vmatpush3.msra.mxu0 %v489_v19 }
  0x81   :  { %775 = vmatprep.subr.mxu0 %v887_v9 }
  0x82   :  { %776 = vmatpush3.msra.mxu0 %v488_v20 }
  0x83   :  { %777 = vmatprep.subr.mxu0 %v887_v9 }
  0x84   :  { %778 = vmatpush3.msra.mxu0 %v487_v21 }
  0x85   :  { %779 = vmatprep.subr.mxu0 %v887_v9 }
  0x86   :  { %780 = vmatpush3.msra.mxu0 %v486_v22 }
  0x87   :  { %781 = vmatprep.subr.mxu0 %v887_v9 }
  0x88   :  { %782 = vmatpush3.msra.mxu0 %v485_v23 }
  0x89   :  { %783 = vmatprep.subr.mxu0 %v887_v9 }
  0x8a   :  { %784 = vmatpush3.msra.mxu0 %v484_v24 }
 0x108   :  { %v628_v25 = vpop.f32.mrf.mxu0 }
 0x10a   :  { %v663_v26 = vpop.f32.mrf.mxu1  ;;  %v629_v27 = vpop.f32.mrf.mxu0 }
 0x10b   :  { %v630_v28 = vadd.f32 %v629_v27, %v628_v25 }
 0x10c   :  { %v664_v30 = vpop.f32.mrf.mxu1 }
 0x10d   :  { %v270_v31 = vadd.f32 %v630_v28, %v594_v29  ;;  %v665_v32 = vadd.f32 %v664_v30, %v663_v26 }
 0x10f   :  { %v340_v37 = vadd.f32 %v665_v32, %v270_v31 }
 0x12a   :  { %v698_v33 = vpop.f32.mrf.mxu0 }
 0x12b   :  { %v733_v34 = vpop.f32.mrf.mxu1 }
 0x12c   :  { %v699_v35 = vpop.f32.mrf.mxu0 }
 0x12d   :  { %v734_v36 = vpop.f32.mrf.mxu1  ;;  %v700_v38 = vadd.f32 %v699_v35, %v698_v33 }
 0x12e   :  { %v735_v40 = vadd.f32 %v734_v36, %v733_v34 }
 0x12f   :  { %v410_v39 = vadd.f32 %v700_v38, %v340_v37 }
 0x131   :  { %v480_v41 = vadd.f32 %v735_v40, %v410_v39 }
 0x133   :  { %v483_v42 = vmax.f32 %v480_v41, 0.0 }
 0x135   :  { %786 = vmatmul.mubr.f32.vlgmr.msra.gmra.mxu0 %v483_v42 }
 0x1f5   :  { %v573_v44 = vpop.f32.mrf.mxu0 }
 0x1f6   :  { %v574_v45 = vadd.f32 %v595_v43, %v573_v44 }
 0x1f7   :  { %v787_v46 = vpop.f32.mrf.mxu0 }
 0x1f8   :  { %577 = vst [vmem:[#allocation8] sm:$0xff] %v574_v45 }
 0x1f9   :  { %867 = shalt.err (!%p864_p5)
}
 0x1fa   :  { %587 = dma.vmem_to_hbm [thread:$0]  %s585_s2, 128, %s943_s5, [#allocation4]  }
 0x1fb   :  { %880 = dma.done.wait [#allocation4], 128  }
 0x1fc   :  { %881 = vsyncadd [#allocation4], 4294967168 }
 0x1fd   :  { %591 = vsyncpa [#allocation3], 1 }
 0x1fe   :  { %592 = vsyncpa [#allocation6], 1 }
 0x1ff   :  { %593 = vsyncpa [#allocation4], 1 }

// kernel: tpu_custom_call.1
= control target key start
LH: loop header
LB: loop body
LE: loop exit
PB: predicated region body
PF: predicated region fallthrough
CT: control target
= control target key end

     0   :  { %10 = vsyncpa [#allocation3], 0  ;;  %s938_s0 = inlined_call_operand.hbm [shape: f32[8,1024], index: 0, kind: input, shape index: {}]   ;;  %s939_s1 = inlined_call_operand.hbm [shape: f32[1024,128], index: 1, kind: input, shape index: {}]   ;;  %s940_s2 = inlined_call_operand.vmem [shape: f32[1,128], index: 2, kind: input, shape index: {}]   ;;  %s941_s3 = inlined_call_operand.hbm [shape: f32[128,128], index: 3, kind: input, shape index: {}]   ;;  %s942_s4 = inlined_call_operand.vmem [shape: f32[1,128], index: 4, kind: input, shape index: {}]   ;;  %s943_s5 = inlined_call_operand.hbm [shape: f32[8,128], index: 5, kind: output, shape index: {}]  }
   0x1   :  { %11 = vsyncpa [#allocation6], 0 }
   0x2   :  { %12 = vsyncpa [#allocation4], 0  ;;  %s882_s18 = smov [#allocation5]  }
   0x3   :  { %s28_s19 = sshll.u32 %s882_s18, 4  ;;  %s29_s19 = int_to_ptr.vmem [resolvable:$true] %s28_s19 }
   0x4   :  { %s804_s20 = scalar_lea.vmem %s29_s19, 16384  ;;  %p809_p1 = scmp.lt.s32.totalorder %s29_s19, %s29_s19 }
   0x5   :  { %p805_p0 = scmp.ne.s32.totalorder %s29_s19, %s804_s20  ;;  %p810_p2 = scmp.lt.s32.totalorder %s804_s20, %s804_s20 }
   0x7   :  { %p811_p3 = por %p810_p2, %p809_p1 }
   0x9   :  { %p812_p4 = pnand %p811_p3, %p805_p0 }
   0xb   :  { %815 = shalt.err (!%p812_p4)
}
   0xc   :  { %s883_s21 = smov 128   ;;  %s884_s22 = smov 8  }
   0xd   :  { %34 = dma.hbm_to_vmem [thread:$0]  %s939_s1, 16384, %s29_s19, [#allocation6], %s883_s21, %s883_s21, %s884_s22  }
   0xe   :  { %s885_s25 = smov [#allocation2]   ;;  %s886_s27 = smov [#allocation7]  }
   0xf   :  { %s19_s26 = sshll.u32 %s885_s25, 4  ;;  %s42_s28 = sshll.u32 %s886_s27, 4  ;;  %s20_s26 = int_to_ptr.vmem [resolvable:$true] %s19_s26  ;;  %s43_s28 = int_to_ptr.vmem [resolvable:$true] %s42_s28 }
  0x10   :  { %s824_s29 = scalar_lea.vmem %s20_s26, 1024  ;;  %p829_p6 = scmp.lt.s32.totalorder %s20_s26, %s20_s26 }
  0x11   :  { %p825_p5 = scmp.ne.s32.totalorder %s20_s26, %s824_s29  ;;  %p830_p7 = scmp.lt.s32.totalorder %s824_s29, %s824_s29 }
  0x13   :  { %p831_p8 = por %p830_p7, %p829_p6 }
  0x15   :  { %p832_p9 = pnand %p831_p8, %p825_p5 }
  0x17   :  { %835 = shalt.err (!%p832_p9)
}
  0x18   :  { %22 = dma.hbm_to_vmem [thread:$0]  %s938_s0, 1024, %s20_s26, [#allocation3]  }
  0x19   :  { %s844_s7 = scalar_lea.vmem %s43_s28, 2048  ;;  %p849_p11 = scmp.lt.s32.totalorder %s43_s28, %s43_s28 }
  0x1a   :  { %p845_p10 = scmp.ne.s32.totalorder %s43_s28, %s844_s7  ;;  %p850_p12 = scmp.lt.s32.totalorder %s844_s7, %s844_s7 }
  0x1c   :  { %p851_p13 = por %p850_p12, %p849_p11 }
  0x1e   :  { %p852_p0 = pnand %p851_p13, %p845_p10 }
  0x20   :  { %855 = shalt.err (!%p852_p0)
}
  0x21   :  { %48 = dma.hbm_to_vmem [thread:$0]  %s941_s3, 2048, %s43_s28, [#allocation6], %s883_s21, %s883_s21, %s884_s22  }
  0x22   :  { %876 = dma.done.wait [#allocation3], 1024  }
  0x23   :  { %877 = vsyncadd [#allocation3], 4294966272 }
  0x24   :  { %878 = dma.done.wait [#allocation6], 18432  }
  0x25   :  { %879 = vsyncadd [#allocation6], 4294948864  ;;  %v99_v0 = vld [vmem:[#allocation5 + $0xf8] sm:$0xff]  ;;  %v98_v4 = vld [vmem:[#allocation5 + $0xf0] sm:$0xff]  ;;  %vm888_vm0 = vmmov 0   ;;  %s889_s11 = smov [#allocation8]  }
  0x26   :  { %v131_v1 = vld [vmem:[#allocation5 + $0x1f8] sm:$0xff]  ;;  %596 = vmatprep.subr.mxu0 %v99_v0  ;;  %v130_v5 = vld [vmem:[#allocation5 + $0x1f0] sm:$0xff]  ;;  %v97_v8 = vld [vmem:[#allocation5 + $0xe8] sm:$0xff] }
  0x27   :  { %v83_v2 = vld [vmem:[#allocation5 + $0x78] sm:$0xff]  ;;  %631 = vmatprep.subr.mxu1 %v131_v1  ;;  %v82_v6 = vld [vmem:[#allocation5 + $0x70] sm:$0xff]  ;;  %v129_v9 = vld [vmem:[#allocation5 + $0x1e8] sm:$0xff] }
  0x28   :  { %v115_v3 = vld [vmem:[#allocation5 + $0x178] sm:$0xff]  ;;  %597 = vmatpush3.msra.mxu0 %v83_v2  ;;  %v114_v7 = vld [vmem:[#allocation5 + $0x170] sm:$0xff]  ;;  %v81_v10 = vld [vmem:[#allocation5 + $0x68] sm:$0xff] }
  0x29   :  { %632 = vmatpush3.msra.mxu1 %v115_v3  ;;  %598 = vmatprep.subr.mxu0 %v98_v4  ;;  %v113_v11 = vld [vmem:[#allocation5 + $0x168] sm:$0xff]  ;;  %v96_v12 = vld [vmem:[#allocation5 + $0xe0] sm:$0xff]  ;;  %v95_v16 = vld [vmem:[#allocation5 + $0xd8] sm:$0xff] }
  0x2a   :  { %633 = vmatprep.subr.mxu1 %v130_v5  ;;  %599 = vmatpush3.msra.mxu0 %v82_v6  ;;  %v128_v13 = vld [vmem:[#allocation5 + $0x1e0] sm:$0xff]  ;;  %v127_v17 = vld [vmem:[#allocation5 + $0x1d8] sm:$0xff]  ;;  %v94_v20 = vld [vmem:[#allocation5 + $0xd0] sm:$0xff] }
  0x2b   :  { %634 = vmatpush3.msra.mxu1 %v114_v7  ;;  %600 = vmatprep.subr.mxu0 %v97_v8  ;;  %v80_v14 = vld [vmem:[#allocation5 + $0x60] sm:$0xff]  ;;  %v79_v18 = vld [vmem:[#allocation5 + $0x58] sm:$0xff]  ;;  %v126_v21 = vld [vmem:[#allocation5 + $0x1d0] sm:$0xff] }
  0x2c   :  { %635 = vmatprep.subr.mxu1 %v129_v9  ;;  %v112_v15 = vld [vmem:[#allocation5 + $0x160] sm:$0xff]  ;;  %601 = vmatpush3.msra.mxu0 %v81_v10  ;;  %v111_v19 = vld [vmem:[#allocation5 + $0x158] sm:$0xff]  ;;  %v78_v22 = vld [vmem:[#allocation5 + $0x50] sm:$0xff] }
  0x2d   :  { %636 = vmatpush3.msra.mxu1 %v113_v11  ;;  %602 = vmatprep.subr.mxu0 %v96_v12  ;;  %v110_v23 = vld [vmem:[#allocation5 + $0x150] sm:$0xff]  ;;  %v93_v24 = vld [vmem:[#allocation5 + $0xc8] sm:$0xff]  ;;  %v92_v28 = vld [vmem:[#allocation5 + $0xc0] sm:$0xff] }
  0x2e   :  { %637 = vmatprep.subr.mxu1 %v128_v13  ;;  %603 = vmatpush3.msra.mxu0 %v80_v14  ;;  %v125_v25 = vld [vmem:[#allocation5 + $0x1c8] sm:$0xff]  ;;  %v124_v29 = vld [vmem:[#allocation5 + $0x1c0] sm:$0xff]  ;;  %v91_v32 = vld [vmem:[#allocation5 + $0xb8] sm:$0xff] }
  0x2f   :  { %638 = vmatpush3.msra.mxu1 %v112_v15  ;;  %604 = vmatprep.subr.mxu0 %v95_v16  ;;  %v77_v26 = vld [vmem:[#allocation5 + $0x48] sm:$0xff]  ;;  %v76_v30 = vld [vmem:[#allocation5 + $0x40] sm:$0xff]  ;;  %v123_v33 = vld [vmem:[#allocation5 + $0x1b8] sm:$0xff] }
  0x30   :  { %639 = vmatprep.subr.mxu1 %v127_v17  ;;  %605 = vmatpush3.msra.mxu0 %v79_v18  ;;  %v109_v27 = vld [vmem:[#allocation5 + $0x148] sm:$0xff]  ;;  %v108_v31 = vld [vmem:[#allocation5 + $0x140] sm:$0xff]  ;;  %v75_v34 = vld [vmem:[#allocation5 + $0x38] sm:$0xff] }
  0x31   :  { %640 = vmatpush3.msra.mxu1 %v111_v19  ;;  %606 = vmatprep.subr.mxu0 %v94_v20  ;;  %v107_v35 = vld [vmem:[#allocation5 + $0x138] sm:$0xff]  ;;  %v90_v36 = vld [vmem:[#allocation5 + $0xb0] sm:$0xff]  ;;  %v89_v40 = vld [vmem:[#allocation5 + $0xa8] sm:$0xff] }
  0x32   :  { %641 = vmatprep.subr.mxu1 %v126_v21  ;;  %607 = vmatpush3.msra.mxu0 %v78_v22  ;;  %v122_v37 = vld [vmem:[#allocation5 + $0x1b0] sm:$0xff]  ;;  %v121_v41 = vld [vmem:[#allocation5 + $0x1a8] sm:$0xff]  ;;  %v88_v44 = vld [vmem:[#allocation5 + $0xa0] sm:$0xff] }
  0x33   :  { %642 = vmatpush3.msra.mxu1 %v110_v23  ;;  %608 = vmatprep.subr.mxu0 %v93_v24  ;;  %v74_v38 = vld [vmem:[#allocation5 + $0x30] sm:$0xff]  ;;  %v73_v42 = vld [vmem:[#allocation5 + $0x28] sm:$0xff]  ;;  %v120_v45 = vld [vmem:[#allocation5 + $0x1a0] sm:$0xff] }
  0x34   :  { %643 = vmatprep.subr.mxu1 %v125_v25  ;;  %609 = vmatpush3.msra.mxu0 %v77_v26  ;;  %v106_v39 = vld [vmem:[#allocation5 + $0x130] sm:$0xff]  ;;  %v105_v43 = vld [vmem:[#allocation5 + $0x128] sm:$0xff]  ;;  %v72_v46 = vld [vmem:[#allocation5 + $0x20] sm:$0xff] }
  0x35   :  { %644 = vmatpush3.msra.mxu1 %v109_v27  ;;  %610 = vmatprep.subr.mxu0 %v92_v28  ;;  %v104_v47 = vld [vmem:[#allocation5 + $0x120] sm:$0xff]  ;;  %v87_v48 = vld [vmem:[#allocation5 + $0x98] sm:$0xff]  ;;  %v86_v52 = vld [vmem:[#allocation5 + $0x90] sm:$0xff] }
  0x36   :  { %645 = vmatprep.subr.mxu1 %v124_v29  ;;  %611 = vmatpush3.msra.mxu0 %v76_v30  ;;  %v119_v49 = vld [vmem:[#allocation5 + $0x198] sm:$0xff]  ;;  %v118_v53 = vld [vmem:[#allocation5 + $0x190] sm:$0xff]  ;;  %v85_v56 = vld [vmem:[#allocation5 + $0x88] sm:$0xff] }
  0x37   :  { %646 = vmatpush3.msra.mxu1 %v108_v31  ;;  %612 = vmatprep.subr.mxu0 %v91_v32  ;;  %v71_v50 = vld [vmem:[#allocation5 + $0x18] sm:$0xff]  ;;  %v70_v54 = vld [vmem:[#allocation5 + $0x10] sm:$0xff]  ;;  %v117_v57 = vld [vmem:[#allocation5 + $0x188] sm:$0xff] }
  0x38   :  { %647 = vmatprep.subr.mxu1 %v123_v33  ;;  %613 = vmatpush3.msra.mxu0 %v75_v34  ;;  %v103_v51 = vld [vmem:[#allocation5 + $0x118] sm:$0xff]  ;;  %v102_v55 = vld [vmem:[#allocation5 + $0x110] sm:$0xff]  ;;  %v69_v58 = vld [vmem:[#allocation5 + $0x8] sm:$0xff] }
  0x39   :  { %648 = vmatpush3.msra.mxu1 %v107_v35  ;;  %614 = vmatprep.subr.mxu0 %v90_v36  ;;  %v101_v59 = vld [vmem:[#allocation5 + $0x108] sm:$0xff]  ;;  %v84_v60 = vld [vmem:[#allocation5 + $0x80] sm:$0xff]  ;;  %v63_v2 = vld [vmem:[#allocation2 + $0x18] sm:$0xff] }
  0x3a   :  { %649 = vmatprep.subr.mxu1 %v122_v37  ;;  %615 = vmatpush3.msra.mxu0 %v74_v38  ;;  %v116_v61 = vld [vmem:[#allocation5 + $0x180] sm:$0xff]  ;;  %v61_v63 = vld [vmem:[#allocation2 + $0x8] sm:$0xff]  ;;  %v163_v3 = vld [vmem:[#allocation5 + $0x2f8] sm:$0xff] }
  0x3b   :  { %650 = vmatpush3.msra.mxu1 %v106_v39  ;;  %616 = vmatprep.subr.mxu0 %v89_v40  ;;  %v68_v62 = vld [vmem:[#allocation5] sm:$0xff]  ;;  %v195_v4 = vld [vmem:[#allocation5 + $0x3f8] sm:$0xff]  ;;  %v62_v5 = vld [vmem:[#allocation2 + $0x10] sm:$0xff] }
  0x3c   :  { %651 = vmatprep.subr.mxu1 %v121_v41  ;;  %617 = vmatpush3.msra.mxu0 %v73_v42  ;;  %v100_v0 = vld [vmem:[#allocation5 + $0x100] sm:$0xff]  ;;  %v147_v6 = vld [vmem:[#allocation5 + $0x278] sm:$0xff]  ;;  %v162_v8 = vld [vmem:[#allocation5 + $0x2f0] sm:$0xff] }
  0x3d   :  { %652 = vmatpush3.msra.mxu1 %v105_v43  ;;  %618 = vmatprep.subr.mxu0 %v88_v44  ;;  %v60_v1 = vld [vmem:[#allocation2] sm:$0xff]  ;;  %v179_v7 = vld [vmem:[#allocation5 + $0x378] sm:$0xff]  ;;  %v194_v9 = vld [vmem:[#allocation5 + $0x3f0] sm:$0xff] }
  0x3e   :  { %653 = vmatprep.subr.mxu1 %v120_v45  ;;  %619 = vmatpush3.msra.mxu0 %v72_v46  ;;  %v146_v10 = vld [vmem:[#allocation5 + $0x270] sm:$0xff]  ;;  %v161_v12 = vld [vmem:[#allocation5 + $0x2e8] sm:$0xff]  ;;  %v160_v16 = vld [vmem:[#allocation5 + $0x2e0] sm:$0xff] }
  0x3f   :  { %654 = vmatpush3.msra.mxu1 %v104_v47  ;;  %620 = vmatprep.subr.mxu0 %v87_v48  ;;  %v178_v11 = vld [vmem:[#allocation5 + $0x370] sm:$0xff]  ;;  %v193_v13 = vld [vmem:[#allocation5 + $0x3e8] sm:$0xff]  ;;  %v192_v17 = vld [vmem:[#allocation5 + $0x3e0] sm:$0xff] }
  0x40   :  { %655 = vmatprep.subr.mxu1 %v119_v49  ;;  %621 = vmatpush3.msra.mxu0 %v71_v50  ;;  %v145_v14 = vld [vmem:[#allocation5 + $0x268] sm:$0xff]  ;;  %v144_v18 = vld [vmem:[#allocation5 + $0x260] sm:$0xff]  ;;  %v159_v20 = vld [vmem:[#allocation5 + $0x2d8] sm:$0xff] }
  0x41   :  { %656 = vmatpush3.msra.mxu1 %v103_v51  ;;  %622 = vmatprep.subr.mxu0 %v86_v52  ;;  %v177_v15 = vld [vmem:[#allocation5 + $0x368] sm:$0xff]  ;;  %v176_v19 = vld [vmem:[#allocation5 + $0x360] sm:$0xff]  ;;  %v191_v21 = vld [vmem:[#allocation5 + $0x3d8] sm:$0xff] }
  0x42   :  { %657 = vmatprep.subr.mxu1 %v118_v53  ;;  %623 = vmatpush3.msra.mxu0 %v70_v54  ;;  %v143_v22 = vld [vmem:[#allocation5 + $0x258] sm:$0xff]  ;;  %v158_v24 = vld [vmem:[#allocation5 + $0x2d0] sm:$0xff]  ;;  %v157_v28 = vld [vmem:[#allocation5 + $0x2c8] sm:$0xff] }
  0x43   :  { %658 = vmatpush3.msra.mxu1 %v102_v55  ;;  %624 = vmatprep.subr.mxu0 %v85_v56  ;;  %v175_v23 = vld [vmem:[#allocation5 + $0x358] sm:$0xff]  ;;  %v190_v25 = vld [vmem:[#allocation5 + $0x3d0] sm:$0xff]  ;;  %v189_v29 = vld [vmem:[#allocation5 + $0x3c8] sm:$0xff] }
  0x44   :  { %659 = vmatprep.subr.mxu1 %v117_v57  ;;  %625 = vmatpush3.msra.mxu0 %v69_v58  ;;  %v142_v26 = vld [vmem:[#allocation5 + $0x250] sm:$0xff]  ;;  %v141_v30 = vld [vmem:[#allocation5 + $0x248] sm:$0xff]  ;;  %v156_v32 = vld [vmem:[#allocation5 + $0x2c0] sm:$0xff] }
  0x45   :  { %660 = vmatpush3.msra.mxu1 %v101_v59  ;;  %626 = vmatprep.subr.mxu0 %v84_v60  ;;  %v174_v27 = vld [vmem:[#allocation5 + $0x350] sm:$0xff]  ;;  %v173_v31 = vld [vmem:[#allocation5 + $0x348] sm:$0xff]  ;;  %v188_v33 = vld [vmem:[#allocation5 + $0x3c0] sm:$0xff] }
  0x46   :  { %661 = vmatprep.subr.mxu1 %v116_v61  ;;  %627 = vmatpush3.msra.mxu0 %v68_v62  ;;  %v140_v34 = vld [vmem:[#allocation5 + $0x240] sm:$0xff]  ;;  %v155_v36 = vld [vmem:[#allocation5 + $0x2b8] sm:$0xff]  ;;  %v154_v40 = vld [vmem:[#allocation5 + $0x2b0] sm:$0xff] }
  0x47   :  { %267 = vmatprep.mubr.f32.mxu0 %v61_v63  ;;  %662 = vmatpush3.msra.mxu1 %v100_v0  ;;  %v172_v35 = vld [vmem:[#allocation5 + $0x340] sm:$0xff]  ;;  %v187_v37 = vld [vmem:[#allocation5 + $0x3b8] sm:$0xff]  ;;  %v186_v41 = vld [vmem:[#allocation5 + $0x3b0] sm:$0xff] }
  0x48   :  { %268 = vmatmul.mubr.f32.vlgmr.msra.gmra.mxu0 %v60_v1  ;;  %337 = vmatprep.mubr.f32.mxu1 %v63_v2  ;;  %v139_v38 = vld [vmem:[#allocation5 + $0x238] sm:$0xff]  ;;  %v138_v42 = vld [vmem:[#allocation5 + $0x230] sm:$0xff]  ;;  %v153_v44 = vld [vmem:[#allocation5 + $0x2a8] sm:$0xff] }
  0x49   :  { %666 = vmatprep.subr.mxu0 %v163_v3  ;;  %701 = vmatprep.subr.mxu1 %v195_v4  ;;  %v171_v39 = vld [vmem:[#allocation5 + $0x338] sm:$0xff]  ;;  %v170_v43 = vld [vmem:[#allocation5 + $0x330] sm:$0xff]  ;;  %v185_v45 = vld [vmem:[#allocation5 + $0x3a8] sm:$0xff] }
  0x4a   :  { %338 = vmatmul.mubr.f32.vlgmr.msra.gmra.mxu1 %v62_v5  ;;  %667 = vmatpush3.msra.mxu0 %v147_v6  ;;  %v137_v46 = vld [vmem:[#allocation5 + $0x228] sm:$0xff]  ;;  %v152_v48 = vld [vmem:[#allocation5 + $0x2a0] sm:$0xff]  ;;  %v151_v52 = vld [vmem:[#allocation5 + $0x298] sm:$0xff] }
  0x4b   :  { %702 = vmatpush3.msra.mxu1 %v179_v7  ;;  %668 = vmatprep.subr.mxu0 %v162_v8  ;;  %v169_v47 = vld [vmem:[#allocation5 + $0x328] sm:$0xff]  ;;  %v184_v49 = vld [vmem:[#allocation5 + $0x3a0] sm:$0xff]  ;;  %v183_v53 = vld [vmem:[#allocation5 + $0x398] sm:$0xff] }
  0x4c   :  { %703 = vmatprep.subr.mxu1 %v194_v9  ;;  %669 = vmatpush3.msra.mxu0 %v146_v10  ;;  %v136_v50 = vld [vmem:[#allocation5 + $0x220] sm:$0xff]  ;;  %v135_v54 = vld [vmem:[#allocation5 + $0x218] sm:$0xff]  ;;  %v150_v56 = vld [vmem:[#allocation5 + $0x290] sm:$0xff]  ;;  %v887_v9 = vmov 0.0  }
  0x4d   :  { %704 = vmatpush3.msra.mxu1 %v178_v11  ;;  %670 = vmatprep.subr.mxu0 %v161_v12  ;;  %v168_v51 = vld [vmem:[#allocation5 + $0x320] sm:$0xff]  ;;  %v167_v55 = vld [vmem:[#allocation5 + $0x318] sm:$0xff]  ;;  %v182_v57 = vld [vmem:[#allocation5 + $0x390] sm:$0xff] }
  0x4e   :  { %705 = vmatprep.subr.mxu1 %v193_v13  ;;  %671 = vmatpush3.msra.mxu0 %v145_v14  ;;  %v134_v58 = vld [vmem:[#allocation5 + $0x210] sm:$0xff]  ;;  %v149_v60 = vld [vmem:[#allocation5 + $0x288] sm:$0xff]  ;;  %v148_v0 = vld [vmem:[#allocation5 + $0x280] sm:$0xff] }
  0x4f   :  { %706 = vmatpush3.msra.mxu1 %v177_v15  ;;  %672 = vmatprep.subr.mxu0 %v160_v16  ;;  %v166_v59 = vld [vmem:[#allocation5 + $0x310] sm:$0xff]  ;;  %v181_v61 = vld [vmem:[#allocation5 + $0x388] sm:$0xff]  ;;  %v180_v1 = vld [vmem:[#allocation5 + $0x380] sm:$0xff] }
  0x50   :  { %707 = vmatprep.subr.mxu1 %v192_v17  ;;  %673 = vmatpush3.msra.mxu0 %v144_v18  ;;  %v133_v62 = vld [vmem:[#allocation5 + $0x208] sm:$0xff]  ;;  %v132_v2 = vld [vmem:[#allocation5 + $0x200] sm:$0xff]  ;;  %v67_v5 = vld [vmem:[#allocation2 + $0x38] sm:$0xff] }
  0x51   :  { %708 = vmatpush3.msra.mxu1 %v176_v19  ;;  %674 = vmatprep.subr.mxu0 %v159_v20  ;;  %v165_v63 = vld [vmem:[#allocation5 + $0x308] sm:$0xff]  ;;  %v164_v4 = vld [vmem:[#allocation5 + $0x300] sm:$0xff]  ;;  %v66_v7 = vld [vmem:[#allocation2 + $0x30] sm:$0xff] }
  0x52   :  { %709 = vmatprep.subr.mxu1 %v191_v21  ;;  %675 = vmatpush3.msra.mxu0 %v143_v22  ;;  %v65_v3 = vld [vmem:[#allocation2 + $0x28] sm:$0xff]  ;;  %v64_v6 = vld [vmem:[#allocation2 + $0x20] sm:$0xff]  ;;  %v499_v8 = vld [vmem:[#allocation7 + $0x78] sm:$0xff] }
  0x53   :  { %710 = vmatpush3.msra.mxu1 %v175_v23  ;;  %676 = vmatprep.subr.mxu0 %v158_v24  ;;  %v498_v10 = vld [vmem:[#allocation7 + $0x70] sm:$0xff]  ;;  %v497_v11 = vld [vmem:[#allocation7 + $0x68] sm:$0xff]  ;;  %v496_v12 = vld [vmem:[#allocation7 + $0x60] sm:$0xff] }
  0x54   :  { %711 = vmatprep.subr.mxu1 %v190_v25  ;;  %677 = vmatpush3.msra.mxu0 %v142_v26  ;;  %v495_v13 = vld [vmem:[#allocation7 + $0x58] sm:$0xff]  ;;  %v494_v14 = vld [vmem:[#allocation7 + $0x50] sm:$0xff]  ;;  %v493_v15 = vld [vmem:[#allocation7 + $0x48] sm:$0xff] }
  0x55   :  { %712 = vmatpush3.msra.mxu1 %v174_v27  ;;  %678 = vmatprep.subr.mxu0 %v157_v28  ;;  %v492_v16 = vld [vmem:[#allocation7 + $0x40] sm:$0xff]  ;;  %v491_v17 = vld [vmem:[#allocation7 + $0x38] sm:$0xff]  ;;  %v490_v18 = vld [vmem:[#allocation7 + $0x30] sm:$0xff] }
  0x56   :  { %713 = vmatprep.subr.mxu1 %v189_v29  ;;  %679 = vmatpush3.msra.mxu0 %v141_v30  ;;  %v489_v19 = vld [vmem:[#allocation7 + $0x28] sm:$0xff]  ;;  %v488_v20 = vld [vmem:[#allocation7 + $0x20] sm:$0xff]  ;;  %v487_v21 = vld [vmem:[#allocation7 + $0x18] sm:$0xff] }
  0x57   :  { %714 = vmatpush3.msra.mxu1 %v173_v31  ;;  %680 = vmatprep.subr.mxu0 %v156_v32  ;;  %v486_v22 = vld [vmem:[#allocation7 + $0x10] sm:$0xff]  ;;  %v485_v23 = vld [vmem:[#allocation7 + $0x8] sm:$0xff]  ;;  %v484_v24 = vld [vmem:[#allocation7] sm:$0xff] }
  0x58   :  { %715 = vmatprep.subr.mxu1 %v188_v33  ;;  %681 = vmatpush3.msra.mxu0 %v140_v34  ;;  %v594_v29 = vld [vmem:[%s940_s2] ss:$0 sm:$0xff]  ;;  %s584_s2 = sshll.u32 %s889_s11, 4  ;;  %s585_s2 = int_to_ptr.vmem [resolvable:$true] %s584_s2 }
  0x59   :  { %716 = vmatpush3.msra.mxu1 %v172_v35  ;;  %682 = vmatprep.subr.mxu0 %v155_v36  ;;  %s856_s12 = scalar_lea.vmem %s585_s2, 128  ;;  %p861_p2 = scmp.lt.s32.totalorder %s585_s2, %s585_s2 }
  0x5a   :  { %717 = vmatprep.subr.mxu1 %v187_v37  ;;  %683 = vmatpush3.msra.mxu0 %v139_v38  ;;  %p857_p1 = scmp.ne.s32.totalorder %s585_s2, %s856_s12  ;;  %p862_p3 = scmp.lt.s32.totalorder %s856_s12, %s856_s12 }
  0x5b   :  { %718 = vmatpush3.msra.mxu1 %v171_v39  ;;  %684 = vmatprep.subr.mxu0 %v154_v40 }
  0x5c   :  { %719 = vmatprep.subr.mxu1 %v186_v41  ;;  %685 = vmatpush3.msra.mxu0 %v138_v42  ;;  %p863_p4 = por %p862_p3, %p861_p2 }
  0x5d   :  { %720 = vmatpush3.msra.mxu1 %v170_v43  ;;  %686 = vmatprep.subr.mxu0 %v153_v44  ;;  %v595_v43 = vld [vmem:[%s942_s4] ss:$0 sm:$0xff] }
  0x5e   :  { %721 = vmatprep.subr.mxu1 %v185_v45  ;;  %687 = vmatpush3.msra.mxu0 %v137_v46  ;;  %p864_p5 = pnand %p863_p4, %p857_p1 }
  0x5f   :  { %722 = vmatpush3.msra.mxu1 %v169_v47  ;;  %688 = vmatprep.subr.mxu0 %v152_v48 }
  0x60   :  { %723 = vmatprep.subr.mxu1 %v184_v49  ;;  %689 = vmatpush3.msra.mxu0 %v136_v50 }
  0x61   :  { %724 = vmatpush3.msra.mxu1 %v168_v51  ;;  %690 = vmatprep.subr.mxu0 %v151_v52 }
  0x62   :  { %725 = vmatprep.subr.mxu1 %v183_v53  ;;  %691 = vmatpush3.msra.mxu0 %v135_v54 }
  0x63   :  { %726 = vmatpush3.msra.mxu1 %v167_v55  ;;  %692 = vmatprep.subr.mxu0 %v150_v56 }
  0x64   :  { %727 = vmatprep.subr.mxu1 %v182_v57  ;;  %693 = vmatpush3.msra.mxu0 %v134_v58 }
  0x65   :  { %728 = vmatpush3.msra.mxu1 %v166_v59  ;;  %694 = vmatprep.subr.mxu0 %v149_v60 }
  0x66   :  { %729 = vmatprep.subr.mxu1 %v181_v61  ;;  %695 = vmatpush3.msra.mxu0 %v133_v62 }
  0x67   :  { %730 = vmatpush3.msra.mxu1 %v165_v63  ;;  %696 = vmatprep.subr.mxu0 %v148_v0 }
  0x68   :  { %731 = vmatprep.subr.mxu1 %v180_v1  ;;  %697 = vmatpush3.msra.mxu0 %v132_v2 }
  0x69   :  { %407 = vmatprep.mubr.f32.mxu0 %v65_v3  ;;  %732 = vmatpush3.msra.mxu1 %v164_v4 }
  0x6a   :  { %477 = vmatprep.mubr.f32.mxu1 %v67_v5  ;;  %408 = vmatmul.mubr.f32.vlgmr.msra.gmra.mxu0 %v64_v6 }
  0x6b   :  { %478 = vmatmul.mubr.f32.vlgmr.msra.gmra.mxu1 %v66_v7  ;;  %753 = vmatprep.subr.mxu0 %v887_v9 }
  0x6c   :  { %754 = vmatpush3.msra.mxu0 %v499_v8  ;;  %785 = vmatprep.mubr.msk.f32.mxu0 %vm888_vm0, %v887_v9 }
  0x6d   :  { %755 = vmatprep.subr.mxu0 %v887_v9 }
  0x6e   :  { %756 = vmatpush3.msra.mxu0 %v498_v10 }
  0x6f   :  { %757 = vmatprep.subr.mxu0 %v887_v9 }
  0x70   :  { %758 = vmatpush3.msra.mxu0 %v497_v11 }
  0x71   :  { %759 = vmatprep.subr.mxu0 %v887_v9 }
  0x72   :  { %760 = vmatpush3.msra.mxu0 %v496_v12 }
  0x73   :  { %761 = vmatprep.subr.mxu0 %v887_v9 }
  0x74   :  { %762 = vmatpush3.msra.mxu0 %v495_v13 }
  0x75   :  { %763 = vmatprep.subr.mxu0 %v887_v9 }
  0x76   :  { %764 = vmatpush3.msra.mxu0 %v494_v14 }
  0x77   :  { %765 = vmatprep.subr.mxu0 %v887_v9 }
  0x78   :  { %766 = vmatpush3.msra.mxu0 %v493_v15 }
  0x79   :  { %767 = vmatprep.subr.mxu0 %v887_v9 }
  0x7a   :  { %768 = vmatpush3.msra.mxu0 %v492_v16 }
  0x7b   :  { %769 = vmatprep.subr.mxu0 %v887_v9 }
  0x7c   :  { %770 = vmatpush3.msra.mxu0 %v491_v17 }
  0x7d   :  { %771 = vmatprep.subr.mxu0 %v887_v9 }
  0x7e   :  { %772 = vmatpush3.msra.mxu0 %v490_v18 }
  0x7f   :  { %773 = vmatprep.subr.mxu0 %v887_v9 }
  0x80   :  { %774 = vmatpush3.msra.mxu0 %v489_v19 }
  0x81   :  { %775 = vmatprep.subr.mxu0 %v887_v9 }
  0x82   :  { %776 = vmatpush3.msra.mxu0 %v488_v20 }
  0x83   :  { %777 = vmatprep.subr.mxu0 %v887_v9 }
  0x84   :  { %778 = vmatpush3.msra.mxu0 %v487_v21 }
  0x85   :  { %779 = vmatprep.subr.mxu0 %v887_v9 }
  0x86   :  { %780 = vmatpush3.msra.mxu0 %v486_v22 }
  0x87   :  { %781 = vmatprep.subr.mxu0 %v887_v9 }
  0x88   :  { %782 = vmatpush3.msra.mxu0 %v485_v23 }
  0x89   :  { %783 = vmatprep.subr.mxu0 %v887_v9 }
  0x8a   :  { %784 = vmatpush3.msra.mxu0 %v484_v24 }
 0x108   :  { %v628_v25 = vpop.f32.mrf.mxu0 }
 0x10a   :  { %v663_v26 = vpop.f32.mrf.mxu1  ;;  %v629_v27 = vpop.f32.mrf.mxu0 }
 0x10b   :  { %v630_v28 = vadd.f32 %v629_v27, %v628_v25 }
 0x10c   :  { %v664_v30 = vpop.f32.mrf.mxu1 }
 0x10d   :  { %v270_v31 = vadd.f32 %v630_v28, %v594_v29  ;;  %v665_v32 = vadd.f32 %v664_v30, %v663_v26 }
 0x10f   :  { %v340_v37 = vadd.f32 %v665_v32, %v270_v31 }
 0x12a   :  { %v698_v33 = vpop.f32.mrf.mxu0 }
 0x12b   :  { %v733_v34 = vpop.f32.mrf.mxu1 }
 0x12c   :  { %v699_v35 = vpop.f32.mrf.mxu0 }
 0x12d   :  { %v734_v36 = vpop.f32.mrf.mxu1  ;;  %v700_v38 = vadd.f32 %v699_v35, %v698_v33 }
 0x12e   :  { %v735_v40 = vadd.f32 %v734_v36, %v733_v34 }
 0x12f   :  { %v410_v39 = vadd.f32 %v700_v38, %v340_v37 }
 0x131   :  { %v480_v41 = vadd.f32 %v735_v40, %v410_v39 }
 0x133   :  { %v483_v42 = vmax.f32 %v480_v41, 0.0 }
 0x135   :  { %786 = vmatmul.mubr.f32.vlgmr.msra.gmra.mxu0 %v483_v42 }
 0x1f5   :  { %v573_v44 = vpop.f32.mrf.mxu0 }
 0x1f6   :  { %v574_v45 = vadd.f32 %v595_v43, %v573_v44 }
 0x1f7   :  { %v787_v46 = vpop.f32.mrf.mxu0 }
 0x1f8   :  { %577 = vst [vmem:[#allocation8] sm:$0xff] %v574_v45 }
 0x1f9   :  { %867 = shalt.err (!%p864_p5)
}
 0x1fa   :  { %587 = dma.vmem_to_hbm [thread:$0]  %s585_s2, 128, %s943_s5, [#allocation4]  }
 0x1fb   :  { %880 = dma.done.wait [#allocation4], 128  }
 0x1fc   :  { %881 = vsyncadd [#allocation4], 4294967168 }
 0x1fd   :  { %591 = vsyncpa [#allocation3], 1 }
 0x1fe   :  { %592 = vsyncpa [#allocation6], 1 }
 0x1ff   :  { %593 = vsyncpa [#allocation4], 1 }

</bundles_post_ra>
